<compile_context>
chip_gen: v6e
topology: v6e:2x2x1
jax: 0.10.0
libtpu: 0.0.40
codegen_flags: <defaults>
</compile_context>

<pallas_src>
import jax
import jax.numpy as jnp
from jax.experimental import pallas as pl
from jax.experimental.pallas import tpu as pltpu


_LANE = 128
_VMEM_BUDGET = 40 << 20          # headroom below v7x's 64 MiB physical VMEM/TC


# ----------------------------------------------------------------------------
# Kernels
# ----------------------------------------------------------------------------
def _xw_kernel(h_ref, w_ref, o_ref):
    """XW = H_tile @ W  (bf16 in, f32 acc, bf16 out)."""
    o_ref[...] = jnp.dot(h_ref[...], w_ref[...],
                         preferred_element_type=jnp.float32).astype(o_ref.dtype)


def _agg_relu_kernel(a_ref, xw_ref, b_ref, o_ref):
    """H'_tile = relu(A_tile @ XW + b)  (bf16 matmul, f32 bias/relu)."""
    acc = jnp.dot(a_ref[...], xw_ref[...], preferred_element_type=jnp.float32)
    o_ref[...] = jnp.maximum(acc + b_ref[...], 0.0).astype(o_ref.dtype)


def _agg_relu_fc_kernel(a_ref, xw_ref, b_ref, wfc_ref, bfc_ref, o_ref):
    """out_tile = relu(A_tile @ XW3 + b3) @ Wfc + bfc  (fc fused, f32 out)."""
    acc = jnp.dot(a_ref[...], xw_ref[...], preferred_element_type=jnp.float32)
    h = jnp.maximum(acc + b_ref[...], 0.0)
    out = jnp.dot(h.astype(jnp.bfloat16), wfc_ref[...],
                  preferred_element_type=jnp.float32) + bfc_ref[...]
    o_ref[...] = out.astype(o_ref.dtype)


# ----------------------------------------------------------------------------
# pallas_call wrappers (row-tiled grid, A streamed, everything else resident)
# ----------------------------------------------------------------------------
def _round_up(v, m):
    return (v + m - 1) // m * m


def _pick_row_tile(n_pad, resident_bytes):
    """Largest 128-multiple row tile dividing n_pad whose double-buffered bf16
    A stream plus resident operands fits the VMEM budget (v7x-safe)."""
    for t in (1024, 512, 256, 128):
        if n_pad % t == 0 and 2 * t * n_pad * 2 + resident_bytes <= _VMEM_BUDGET:
            return t
    return 128


def _compiler_params():
    return pltpu.CompilerParams(dimension_semantics=("parallel",),
                                vmem_limit_bytes=48 << 20)


def _xw_call(h, w, tile_n):
    n_pad, c_in = h.shape
    c_out = w.shape[1]
    return pl.pallas_call(
        _xw_kernel,
        out_shape=jax.ShapeDtypeStruct((n_pad, c_out), jnp.bfloat16),
        grid=(n_pad // tile_n,),
        in_specs=[pl.BlockSpec((tile_n, c_in), lambda i: (i, 0)),
                  pl.BlockSpec((c_in, c_out), lambda i: (0, 0))],
        out_specs=pl.BlockSpec((tile_n, c_out), lambda i: (i, 0)),
        compiler_params=_compiler_params(),
        cost_estimate=pl.CostEstimate(
            flops=2 * n_pad * c_in * c_out,
            transcendentals=0,
            bytes_accessed=(n_pad * c_in + c_in * c_out + n_pad * c_out) * 2),
    )(h, w)


def _agg_call(a, xw, b, tile_n):
    n_pad, c = xw.shape
    return pl.pallas_call(
        _agg_relu_kernel,
        out_shape=jax.ShapeDtypeStruct((n_pad, c), jnp.bfloat16),
        grid=(n_pad // tile_n,),
        in_specs=[pl.BlockSpec((tile_n, n_pad), lambda i: (i, 0)),   # stream A
                  pl.BlockSpec((n_pad, c), lambda i: (0, 0)),        # resident
                  pl.BlockSpec((1, c), lambda i: (0, 0))],           # resident
        out_specs=pl.BlockSpec((tile_n, c), lambda i: (i, 0)),
        compiler_params=_compiler_params(),
        cost_estimate=pl.CostEstimate(
            flops=2 * n_pad * n_pad * c,
            transcendentals=0,
            bytes_accessed=n_pad * n_pad * 2 + 2 * n_pad * c * 2 + 4 * c),
    )(a, xw, b)


def _agg_fc_call(a, xw, b, wfc, bfc, tile_n):
    n_pad, c = xw.shape
    c_out = wfc.shape[1]
    return pl.pallas_call(
        _agg_relu_fc_kernel,
        out_shape=jax.ShapeDtypeStruct((n_pad, c_out), jnp.float32),
        grid=(n_pad // tile_n,),
        in_specs=[pl.BlockSpec((tile_n, n_pad), lambda i: (i, 0)),   # stream A
                  pl.BlockSpec((n_pad, c), lambda i: (0, 0)),
                  pl.BlockSpec((1, c), lambda i: (0, 0)),
                  pl.BlockSpec((c, c_out), lambda i: (0, 0)),
                  pl.BlockSpec((1, c_out), lambda i: (0, 0))],
        out_specs=pl.BlockSpec((tile_n, c_out), lambda i: (i, 0)),
        compiler_params=_compiler_params(),
        cost_estimate=pl.CostEstimate(
            flops=2 * n_pad * n_pad * c + 2 * n_pad * c * c_out,
            transcendentals=0,
            bytes_accessed=(n_pad * n_pad * 2 + n_pad * c * 2
                            + c * c_out * 2 + n_pad * c_out * 4)),
    )(a, xw, b, wfc, bfc)


# ----------------------------------------------------------------------------
# Forward pass
# ----------------------------------------------------------------------------
def build_normalized_adjacency(edge_index, num_nodes):
    """Dense A_hat = D^{-1/2} (A + I) D^{-1/2}, matching PyG GCNConv defaults.

    edge_index[0] = source, edge_index[1] = target; A[target, source] += 1.
    """
    src = edge_index[0]
    dst = edge_index[1]
    a = jnp.zeros((num_nodes, num_nodes), jnp.float32)
    a = a.at[dst, src].add(1.0)
    a = a + jnp.eye(num_nodes, dtype=jnp.float32)
    deg = jnp.sum(a, axis=1)
    dinv = jnp.where(deg > 0.0, 1.0 / jnp.sqrt(deg), 0.0)
    return dinv[:, None] * a * dinv[None, :]


def _pad_mat(m, rows, cols, dtype):
    out = jnp.zeros((rows, cols), jnp.float32)
    out = out.at[:m.shape[0], :m.shape[1]].set(m.astype(jnp.float32))
    return out.astype(dtype)


def graph_gcn_forward(x, edge_index, params):
    """params: dict of w1,b1,w2,b2,w3,b3,wfc,bfc (biases shaped [1, C])."""
    n, c_in = x.shape
    hidden = params["w1"].shape[1]
    c_out = params["wfc"].shape[1]

    n_pad = _round_up(max(n, _LANE), _LANE)
    cin_p = _round_up(c_in, _LANE)
    hid_p = _round_up(hidden, _LANE)
    cout_p = _round_up(c_out, _LANE)

    # Dense normalized adjacency, zero-padded, bf16 for the MXU.
    a = build_normalized_adjacency(edge_index, n)
    a_bf16 = _pad_mat(a, n_pad, n_pad, jnp.bfloat16)

    h = _pad_mat(x, n_pad, cin_p, jnp.bfloat16)
    w1 = _pad_mat(params["w1"], cin_p, hid_p, jnp.bfloat16)
    w2 = _pad_mat(params["w2"], hid_p, hid_p, jnp.bfloat16)
    w3 = _pad_mat(params["w3"], hid_p, hid_p, jnp.bfloat16)
    wfc = _pad_mat(params["wfc"], hid_p, cout_p, jnp.bfloat16)
    b1 = _pad_mat(params["b1"], 1, hid_p, jnp.float32)
    b2 = _pad_mat(params["b2"], 1, hid_p, jnp.float32)
    b3 = _pad_mat(params["b3"], 1, hid_p, jnp.float32)
    bfc = _pad_mat(params["bfc"], 1, cout_p, jnp.float32)

    resident_bytes = (n_pad * hid_p * 2          # XW resident
                      + hid_p * hid_p * 2        # W resident (largest)
                      + hid_p * cout_p * 2       # Wfc
                      + 4 * (hid_p + cout_p))    # biases
    tile_n = _pick_row_tile(n_pad, resident_bytes)

    # conv1 -> relu -> dropout(eval: identity)
    h = _agg_call(a_bf16, _xw_call(h, w1, tile_n), b1, tile_n)
    # conv2 -> relu -> dropout(eval: identity)
    h = _agg_call(a_bf16, _xw_call(h, w2, tile_n), b2, tile_n)
    # conv3 -> relu -> fc (fused into the aggregation kernel)
    out = _agg_fc_call(a_bf16, _xw_call(h, w3, tile_n), b3, wfc, bfc, tile_n)

    return out[:n, :c_out]


# ----------------------------------------------------------------------------
# Params / reference / test
# ----------------------------------------------------------------------------
def init_params(key, in_channels, hidden_channels, out_channels):
    keys = jax.random.split(key, 8)

    def lin(k, fan_in, fan_out):
        scale = 1.0 / jnp.sqrt(jnp.float32(fan_in))
        return jax.random.uniform(k, (fan_in, fan_out), jnp.float32, -scale, scale)

    return {
        "w1": lin(keys[0], in_channels, hidden_channels),
        "b1": jnp.zeros((1, hidden_channels), jnp.float32),
        "w2": lin(keys[1], hidden_channels, hidden_channels),
        "b2": jnp.zeros((1, hidden_channels), jnp.float32),
        "w3": lin(keys[2], hidden_channels, hidden_channels),
        "b3": jnp.zeros((1, hidden_channels), jnp.float32),
        "wfc": lin(keys[3], hidden_channels, out_channels),
        "bfc": jax.random.uniform(keys[4], (1, out_channels), jnp.float32,
                                  -1.0 / jnp.sqrt(jnp.float32(hidden_channels)),
                                  1.0 / jnp.sqrt(jnp.float32(hidden_channels))),
    }


def _reference_forward(x, edge_index, params):
    """Pure-JAX f32 reference for correctness check."""
    a = build_normalized_adjacency(edge_index, x.shape[0])
    h = x
    for w, b in (("w1", "b1"), ("w2", "b2"), ("w3", "b3")):
        h = jnp.maximum(a @ (h @ params[w]) + params[b], 0.0)
    return h @ params["wfc"] + params["bfc"]


if __name__ == "__main__":
    key = jax.random.PRNGKey(0)
    k_x, k_e, k_p = jax.random.split(key, 3)

    # Small synthetic graph: 16 nodes, 8 input features, hidden=32, out=8.
    num_nodes, in_channels, hidden_channels, out_channels = 16, 8, 32, 8
    num_edges = 24

    x = jax.random.normal(k_x, (num_nodes, in_channels), jnp.float32)
    edge_index = jax.random.randint(k_e, (2, num_edges), 0, num_nodes, jnp.int32)

    params = init_params(k_p, in_channels, hidden_channels, out_channels)

    out = graph_gcn_forward(x, edge_index, params)
    out = jax.block_until_ready(out)

    ref = _reference_forward(x, edge_index, params)
    assert out.shape == (num_nodes, out_channels)
    # bf16 MXU feed -> ~1e-2 relative error vs the f32 reference.
    assert jnp.allclose(out, ref, atol=5e-2, rtol=5e-2), (
        float(jnp.max(jnp.abs(out - ref))))

    print("KERNEL_OK")
</pallas_src>

<mosaic_0001>
module attributes {stable_mosaic.version = 11 : i64} {
  func.func @_xw_kernel(%arg0: i32, %arg1: memref<128x128xbf16, #tpu.memory_space<vmem>>, %arg2: memref<128x128xbf16, #tpu.memory_space<vmem>>, %arg3: memref<128x128xbf16, #tpu.memory_space<vmem>>) attributes {dimension_semantics = [#tpu.dimension_semantics<parallel>], iteration_bounds = array<i64: 1>, scalar_prefetch = 0 : i64, scratch_operands = 0 : i64, tpu.core_type = #tpu.core_type<tc>, window_params = [{transform_indices = @transform_0, window_bounds = array<i64: 128, 128>}, {pipeline_mode = #tpu.pipeline_mode<synchronous>, transform_indices = @transform_1, window_bounds = array<i64: 128, 128>}, {transform_indices = @transform_2, window_bounds = array<i64: 128, 128>}]} {
    %c0 = arith.constant 0 : index
    %c0_0 = arith.constant 0 : index
    %0 = vector.load %arg1[%c0, %c0_0] : memref<128x128xbf16, #tpu.memory_space<vmem>>, vector<128x128xbf16>
    %c0_1 = arith.constant 0 : index
    %c0_2 = arith.constant 0 : index
    %1 = vector.load %arg2[%c0_1, %c0_2] : memref<128x128xbf16, #tpu.memory_space<vmem>>, vector<128x128xbf16>
    %cst = arith.constant dense<0.000000e+00> : vector<128x128xf32>
    %2 = tpu.matmul %0, %1, %cst {dimension_numbers = #tpu.dot_dimension_numbers<[1], [0], [0], [1], [0, 0, 1, 1], [], []>} : vector<128x128xbf16>, vector<128x128xbf16>, vector<128x128xf32> -> vector<128x128xf32>
    %3 = arith.truncf %2 : vector<128x128xf32> to vector<128x128xbf16>
    %c0_3 = arith.constant 0 : index
    %c0_4 = arith.constant 0 : index
    %4 = vector.load %arg3[%c0_3, %c0_4] : memref<128x128xbf16, #tpu.memory_space<vmem>>, vector<128x128xbf16>
    tpu.vector_store %arg3[%c0_3, %c0_4], %3 {strides = array<i32>} : memref<128x128xbf16, #tpu.memory_space<vmem>>, vector<128x128xbf16>,
    return
  }
  func.func @transform_0(%arg0: i32) -> (i32, i32) {
    %c0_i32 = arith.constant 0 : i32
    %c0_i32_0 = arith.constant 0 : i32
    return %arg0, %c0_i32 : i32, i32
  }
  func.func @transform_1(%arg0: i32) -> (i32, i32) {
    %c0_i32 = arith.constant 0 : i32
    %c0_i32_0 = arith.constant 0 : i32
    %c0_i32_1 = arith.constant 0 : i32
    return %c0_i32, %c0_i32_0 : i32, i32
  }
  func.func @transform_2(%arg0: i32) -> (i32, i32) {
    %c0_i32 = arith.constant 0 : i32
    %c0_i32_0 = arith.constant 0 : i32
    return %arg0, %c0_i32 : i32, i32
  }
}

</mosaic_0001>

<bundles_post_ra>
// kernel: tpu_custom_call.1
= control target key start
LH: loop header
LB: loop body
LE: loop exit
PB: predicated region body
PF: predicated region fallthrough
CT: control target
= control target key end

     0   :  { %7 = vsyncpa [#allocation3], 0  ;;  %s648_s0 = inlined_call_operand.hbm [shape: bf16[128,128], index: 0, kind: input, shape index: {}]   ;;  %s649_s1 = inlined_call_operand.hbm [shape: bf16[128,128], index: 1, kind: input, shape index: {}]   ;;  %s650_s2 = inlined_call_operand.hbm [shape: bf16[128,128], index: 2, kind: output, shape index: {}]  }
   0x1   :  { %8 = vsyncpa [#allocation6], 0 }
   0x2   :  { %9 = vsyncpa [#allocation4], 0  ;;  %s610_s9 = smov [#allocation2]  }
   0x3   :  { %s15_s10 = sshll.u32 %s610_s9, 4  ;;  %s16_s10 = int_to_ptr.vmem [resolvable:$true] %s15_s10 }
   0x4   :  { %s552_s11 = scalar_lea.vmem %s16_s10, 1024  ;;  %p557_p1 = scmp.lt.s32.totalorder %s16_s10, %s16_s10 }
   0x5   :  { %p553_p0 = scmp.ne.s32.totalorder %s16_s10, %s552_s11  ;;  %p558_p2 = scmp.lt.s32.totalorder %s552_s11, %s552_s11 }
   0x7   :  { %p559_p3 = por %p558_p2, %p557_p1 }
   0x9   :  { %p560_p4 = pnand %p559_p3, %p553_p0 }
   0xb   :  { %563 = shalt.err (!%p560_p4)
}
   0xc   :  { %s611_s12 = smov 64   ;;  %s612_s13 = smov 4  }
   0xd   :  { %21 = dma.hbm_to_vmem [thread:$0]  %s648_s0, 1024, %s16_s10, [#allocation3], %s611_s12, %s611_s12, %s612_s13  }
   0xe   :  { %s613_s16 = smov [#allocation5]  }
   0xf   :  { %s27_s17 = sshll.u32 %s613_s16, 4  ;;  %s28_s17 = int_to_ptr.vmem [resolvable:$true] %s27_s17 }
  0x10   :  { %s572_s18 = scalar_lea.vmem %s28_s17, 1024  ;;  %p577_p6 = scmp.lt.s32.totalorder %s28_s17, %s28_s17 }
  0x11   :  { %p573_p5 = scmp.ne.s32.totalorder %s28_s17, %s572_s18  ;;  %p578_p7 = scmp.lt.s32.totalorder %s572_s18, %s572_s18 }
  0x13   :  { %p579_p8 = por %p578_p7, %p577_p6 }
  0x15   :  { %p580_p9 = pnand %p579_p8, %p573_p5 }
  0x17   :  { %583 = shalt.err (!%p580_p9)
}
  0x18   :  { %33 = dma.hbm_to_vmem [thread:$0]  %s649_s1, 1024, %s28_s17, [#allocation6], %s611_s12, %s611_s12, %s612_s13  }
  0x19   :  { %604 = dma.done.wait [#allocation3], 1024  }
  0x1a   :  { %605 = vsyncadd [#allocation3], 4294966272 }
  0x1b   :  { %606 = dma.done.wait [#allocation6], 1024  }
  0x1c   :  { %607 = vsyncadd [#allocation6], 4294966272  ;;  %v528_v0 = vld [vmem:[#allocation5 + $0x38] sm:$0xff]   ;;  %v529_v1 = vld [vmem:[#allocation5 + $0x30] sm:$0xff]   ;;  %s614_s0 = smov [#allocation7]  }
  0x1d   :  { %475 = vmatprep.subr.bf16.mxu0 %v528_v0  ;;  %507 = vmatprep.subr.bf16.mxu1 %v528_v0  ;;  %v530_v2 = vld [vmem:[#allocation5 + $0x28] sm:$0xff]   ;;  %v531_v3 = vld [vmem:[#allocation5 + $0x20] sm:$0xff]   ;;  %v532_v6 = vld [vmem:[#allocation5 + $0x18] sm:$0xff]   ;;  %s351_s1 = sshll.u32 %s614_s0, 4  ;;  %s352_s1 = int_to_ptr.vmem [resolvable:$true] %s351_s1 }
  0x1e   :  { %476 = vmatpush3.bf16.msra.mxu0 %v528_v0  ;;  %515 = vmatpush3.bf16.msra.mxu1 %v528_v0  ;;  %v536_v4 = vld [vmem:[#allocation2] sm:$0xff]   ;;  %v533_v7 = vld [vmem:[#allocation5 + $0x10] sm:$0xff]   ;;  %v534_v8 = vld [vmem:[#allocation5 + $0x8] sm:$0xff]   ;;  %s584_s21 = scalar_lea.vmem %s352_s1, 1024  ;;  %p589_p11 = scmp.lt.s32.totalorder %s352_s1, %s352_s1 }
  0x1f   :  { %477 = vmatprep.subr.bf16.mxu0 %v529_v1  ;;  %508 = vmatprep.subr.bf16.mxu1 %v529_v1  ;;  %v537_v5 = vld [vmem:[#allocation2 + $0x20] sm:$0xff]   ;;  %v538_v10 = vld [vmem:[#allocation2 + $0x8] sm:$0xff]   ;;  %v540_v12 = vld [vmem:[#allocation2 + $0x10] sm:$0xff]   ;;  %p585_p10 = scmp.ne.s32.totalorder %s352_s1, %s584_s21  ;;  %p590_p12 = scmp.lt.s32.totalorder %s584_s21, %s584_s21 }
  0x20   :  { %491 = vmatprep.mubr.bf16.mxu0 %v536_v4  ;;  %499 = vmatprep.mubr.bf16.mxu1 %v537_v5  ;;  %v535_v9 = vld [vmem:[#allocation5] sm:$0xff]   ;;  %v539_v11 = vld [vmem:[#allocation2 + $0x28] sm:$0xff]   ;;  %v541_v13 = vld [vmem:[#allocation2 + $0x30] sm:$0xff]  }
  0x21   :  { %v542_v14 = vld [vmem:[#allocation2 + $0x18] sm:$0xff]   ;;  %p591_p13 = por %p590_p12, %p589_p11 }
  0x22   :  { %478 = vmatpush3.bf16.msra.mxu0 %v529_v1  ;;  %516 = vmatpush3.bf16.msra.mxu1 %v529_v1  ;;  %v543_v15 = vld [vmem:[#allocation2 + $0x38] sm:$0xff]  }
  0x23   :  { %479 = vmatprep.subr.bf16.mxu0 %v530_v2  ;;  %509 = vmatprep.subr.bf16.mxu1 %v530_v2  ;;  %p592_p0 = pnand %p591_p13, %p585_p10 }
  0x26   :  { %480 = vmatpush3.bf16.msra.mxu0 %v530_v2  ;;  %517 = vmatpush3.bf16.msra.mxu1 %v530_v2 }
  0x27   :  { %481 = vmatprep.subr.bf16.mxu0 %v531_v3  ;;  %510 = vmatprep.subr.bf16.mxu1 %v531_v3 }
  0x2a   :  { %482 = vmatpush3.bf16.msra.mxu0 %v531_v3  ;;  %518 = vmatpush3.bf16.msra.mxu1 %v531_v3 }
  0x2b   :  { %483 = vmatprep.subr.bf16.mxu0 %v532_v6  ;;  %511 = vmatprep.subr.bf16.mxu1 %v532_v6 }
  0x2e   :  { %484 = vmatpush3.bf16.msra.mxu0 %v532_v6  ;;  %519 = vmatpush3.bf16.msra.mxu1 %v532_v6 }
  0x2f   :  { %485 = vmatprep.subr.bf16.mxu0 %v533_v7  ;;  %512 = vmatprep.subr.bf16.mxu1 %v533_v7 }
  0x32   :  { %486 = vmatpush3.bf16.msra.mxu0 %v533_v7  ;;  %520 = vmatpush3.bf16.msra.mxu1 %v533_v7 }
  0x33   :  { %487 = vmatprep.subr.bf16.mxu0 %v534_v8  ;;  %513 = vmatprep.subr.bf16.mxu1 %v534_v8 }
  0x36   :  { %488 = vmatpush3.bf16.msra.mxu0 %v534_v8  ;;  %521 = vmatpush3.bf16.msra.mxu1 %v534_v8 }
  0x37   :  { %489 = vmatprep.subr.bf16.mxu0 %v535_v9  ;;  %514 = vmatprep.subr.bf16.mxu1 %v535_v9 }
  0x3a   :  { %490 = vmatpush3.bf16.msra.mxu0 %v535_v9  ;;  %522 = vmatpush3.bf16.msra.mxu1 %v535_v9 }
  0x3d   :  { %492 = vmatmul.mubr.bf16.vlgmr.msra.gmra.mxu0 %v538_v10  ;;  %500 = vmatmul.mubr.bf16.vlgmr.msra.gmra.mxu1 %v539_v11 }
  0x3e   :  { %495 = vmatprep.mubr.bf16.mxu0 %v540_v12  ;;  %503 = vmatprep.mubr.bf16.mxu1 %v541_v13 }
  0x45   :  { %496 = vmatmul.mubr.bf16.gmra.mxu0 %v542_v14  ;;  %504 = vmatmul.mubr.bf16.gmra.mxu1 %v543_v15 }
  0xfd   :  { %v493_v16 = vpop.f32.mrf.mxu0  ;;  %v501_v17 = vpop.f32.mrf.mxu1 }
  0xff   :  { %v203_v18 = vpop.f32.mrf.mxu0  ;;  %v235_v19 = vpop.f32.mrf.mxu1 }
 0x101   :  { %v494_v20 = vpop.f32.mrf.mxu0  ;;  %v502_v21 = vpop.f32.mrf.mxu1 }
 0x102   :  { %v420_v22 = vpack.c.bf16 %v494_v20, %v493_v16  ;;  %v440_v23 = vpack.c.bf16 %v502_v21, %v501_v17 }
 0x103   :  { %v206_v24 = vpop.f32.mrf.mxu0  ;;  %v238_v25 = vpop.f32.mrf.mxu1 }
 0x104   :  { %452 = vst [vmem:[#allocation7 + $0x8] sm:$0xff] %v420_v22   ;;  %456 = vst [vmem:[#allocation7 + $0x28] sm:$0xff] %v440_v23   ;;  %v415_v26 = vpack.c.bf16 %v206_v24, %v203_v18  ;;  %v435_v27 = vpack.c.bf16 %v238_v25, %v235_v19 }
 0x105   :  { %v497_v28 = vpop.f32.mrf.mxu0  ;;  %v505_v29 = vpop.f32.mrf.mxu1 }
 0x106   :  { %416 = vst [vmem:[#allocation7] sm:$0xff] %v415_v26   ;;  %455 = vst [vmem:[#allocation7 + $0x20] sm:$0xff] %v435_v27  }
 0x107   :  { %v219_v30 = vpop.f32.mrf.mxu0  ;;  %v251_v31 = vpop.f32.mrf.mxu1 }
 0x109   :  { %v498_v32 = vpop.f32.mrf.mxu0  ;;  %v506_v33 = vpop.f32.mrf.mxu1 }
 0x10a   :  { %v430_v34 = vpack.c.bf16 %v498_v32, %v497_v28  ;;  %v450_v35 = vpack.c.bf16 %v506_v33, %v505_v29 }
 0x10b   :  { %v222_v36 = vpop.f32.mrf.mxu0  ;;  %v254_v37 = vpop.f32.mrf.mxu1 }
 0x10c   :  { %454 = vst [vmem:[#allocation7 + $0x18] sm:$0xff] %v430_v34   ;;  %458 = vst [vmem:[#allocation7 + $0x38] sm:$0xff] %v450_v35   ;;  %v425_v38 = vpack.c.bf16 %v222_v36, %v219_v30  ;;  %v445_v39 = vpack.c.bf16 %v254_v37, %v251_v31 }
 0x10e   :  { %453 = vst [vmem:[#allocation7 + $0x10] sm:$0xff] %v425_v38   ;;  %457 = vst [vmem:[#allocation7 + $0x30] sm:$0xff] %v445_v39  }
 0x10f   :  { %595 = shalt.err (!%p592_p0)
}
 0x110   :  { %357 = dma.vmem_to_hbm [thread:$0]  %s352_s1, 1024, %s650_s2, [#allocation4], %s611_s12, %s611_s12, %s612_s13  }
 0x111   :  { %608 = dma.done.wait [#allocation4], 1024  }
 0x112   :  { %609 = vsyncadd [#allocation4], 4294966272 }
 0x113   :  { %361 = vsyncpa [#allocation3], 1 }
 0x114   :  { %362 = vsyncpa [#allocation6], 1 }
 0x115   :  { %363 = vsyncpa [#allocation4], 1 }

</bundles_post_ra>
